<compile_context>
chip_gen: v7x
topology: tpu7x:2x2x1
jax: 0.10.0
libtpu: 0.0.40
codegen_flags: <defaults>
</compile_context>

<pallas_src>
import functools

import jax
import jax.numpy as jnp
from jax.experimental import pallas as pl
from jax.experimental.pallas import tpu as pltpu


def _make_divisible(ch, divisor=8, min_ch=None):
    if min_ch is None:
        min_ch = divisor
    new_ch = max(min_ch, int(ch + divisor / 2) // divisor * divisor)
    if new_ch < 0.9 * ch:
        new_ch += divisor
    return new_ch


def _round_up(x, m):
    return ((x + m - 1) // m) * m


def _tpu_vmem_and_cores():
    """Best-effort (physical VMEM bytes, TensorCores per chip)."""
    vmem = 64 << 20   # conservative default (v7x size)
    cores = 1
    try:
        info = pltpu.get_tpu_info()
        vmem = int(getattr(info, "vmem_capacity_bytes", vmem))
        for name in ("num_tensorcores", "tensorcores_per_chip", "num_cores",
                     "cores_per_chip"):
            v = getattr(info, name, None)
            if v:
                cores = int(v)
                break
    except Exception:
        pass
    if cores == 1:
        try:
            kind = jax.devices()[0].device_kind.lower()
            if "v7" in kind or "7x" in kind:
                cores = 2
        except Exception:
            pass
    return vmem, cores


def _se_kernel(x_ref, w1t_ref, b1_ref, w2t_ref, b2_ref, o_ref, *,
               inv_hw, channels_on_lanes):
    # Layout A (NCHW): x_ref (Nb, C, HW)  -- HW on lanes.
    # Layout B (NHWC): x_ref (Nb, HW, C)  -- C on lanes (lane-dense for small HW).
    # w1t: (C, Sq)  b1: (1, Sq)  w2t: (Sq, C)  b2: (1, C)
    x = x_ref[...]                                    # native dtype (f32 / bf16)

    red_axis = 1 if channels_on_lanes else 2
    # f32 accumulation without materializing an f32 copy of the whole block.
    pooled = jnp.sum(x, axis=red_axis, dtype=jnp.float32) * inv_hw     # (Nb, C)

    # fc1 (1x1 conv == dense over channels) + ReLU.
    h = jnp.dot(pooled, w1t_ref[...], preferred_element_type=jnp.float32)
    h = jnp.maximum(h + b1_ref[...], 0.0)                              # (Nb, Sq)

    # fc2 with hardsigmoid constants folded into w2t/b2 by the wrapper:
    #   hardsigmoid(h @ w2.T + b2) == clip(h @ (w2.T/6) + (b2+3)/6, 0, 1)
    s = jnp.dot(h, w2t_ref[...], preferred_element_type=jnp.float32)
    s = jnp.clip(s + b2_ref[...], 0.0, 1.0)                            # (Nb, C)
    s = s.astype(x.dtype)

    if channels_on_lanes:
        o_ref[...] = (x * s[:, None, :]).astype(o_ref.dtype)
    else:
        o_ref[...] = (x * s[:, :, None]).astype(o_ref.dtype)


def _reference(x, w1, b1, w2, b2, *, data_format="NCHW"):
    xf = x.astype(jnp.float32)
    if data_format == "NCHW":
        pooled = jnp.mean(xf, axis=(2, 3))
    else:
        pooled = jnp.mean(xf, axis=(1, 2))
    h = jnp.maximum(pooled @ w1.T + b1, 0.0)
    s = jnp.clip((h @ w2.T + b2 + 3.0) / 6.0, 0.0, 1.0)
    if data_format == "NCHW":
        return xf * s[:, :, None, None]
    return xf * s[:, None, None, :]


def squeeze_excitation(x, w1, b1, w2, b2, *, data_format="NCHW", block_n=None):
    """SqueezeExcitation forward.

    x: (N, C, H, W) if data_format == "NCHW" (PyTorch-native) or (N, H, W, C)
       if "NHWC" (lane-dense for the small-spatial SE stages).
    w1: (Sq, C); b1: (Sq,); w2: (C, Sq); b2: (C,)   (1x1 conv weights, squeezed).
    block_n: optional override of samples per grid step (testing / tuning).
    """
    if data_format == "NCHW":
        N, C, H, W = x.shape
        channels_on_lanes = False
    elif data_format == "NHWC":
        N, H, W, C = x.shape
        channels_on_lanes = True
    else:
        raise ValueError(f"unsupported data_format: {data_format}")
    HW = H * W
    Sq = w1.shape[0]
    itemsize = jnp.dtype(x.dtype).itemsize

    # Free reshape (row-major): spatial dims collapse; no wrapper transposes.
    x3 = x.reshape((N, HW, C) if channels_on_lanes else (N, C, HW))

    # Pre-transpose weights; fold hardsigmoid affine constants into fc2.
    w1t = jnp.transpose(w1).astype(jnp.float32)               # (C, Sq)
    b1r = b1.reshape(1, Sq).astype(jnp.float32)
    w2t = (jnp.transpose(w2) / 6.0).astype(jnp.float32)       # (Sq, C)
    b2r = ((b2 + 3.0) / 6.0).reshape(1, C).astype(jnp.float32)

    # ---- Generation-aware block sizing ----
    vmem_cap, cores = _tpu_vmem_and_cores()
    per_sample_bytes = C * HW * itemsize
    # Headroom for a possible f32 reduce intermediate when input is sub-f32.
    f32_tmp_per_sample = 0 if itemsize >= 4 else C * HW * 4
    budget_bytes = int(vmem_cap * 0.4)                        # ~51 MiB v5e/v6e, ~25 MiB v7x
    denom = 4 * per_sample_bytes + f32_tmp_per_sample         # 2x buf x (in+out) + temp

    if block_n is None:
        nb = max(1, budget_bytes // max(denom, 1))
        nb = min(nb, N)
        # Only split to feed a second TensorCore on multi-TC chips (v7x).
        if cores >= 2 and pl.cdiv(N, nb) < 2 and nb > 1:
            nb = pl.cdiv(nb, 2)
    else:
        nb = max(1, min(int(block_n), N))
    steps = pl.cdiv(N, nb)                                    # partial last block is fine:
    grid = (steps,)                                           # samples are independent.

    block_bytes = nb * per_sample_bytes
    weight_bytes = (w1t.size + b1r.size + w2t.size + b2r.size) * 4
    vmem_needed = (4 * block_bytes + nb * f32_tmp_per_sample
                   + 2 * weight_bytes + (2 << 20))

    # 3-deep pipelining on the big operands when the pipeline is DMA-on-DMA
    # (>= 3 steps) and there is VMEM headroom.
    use_triple = steps >= 3 and (vmem_needed + 2 * block_bytes) <= (vmem_cap - (16 << 20))
    if use_triple:
        vmem_needed += 2 * block_bytes
    vmem_limit = int(min(max(vmem_needed, 16 << 20), max(vmem_cap - (16 << 20), 16 << 20)))

    # Advisory cost: bytes reflect the padded (sublane x lane) tile footprint.
    lane_dim, sub_dim = (C, HW) if channels_on_lanes else (HW, C)
    padded_plane = _round_up(sub_dim, 8) * _round_up(lane_dim, 128)
    cost = pl.CostEstimate(
        flops=2 * N * (C * Sq + Sq * C) + N * C * HW + N * C * HW,
        transcendentals=0,
        bytes_accessed=2 * N * padded_plane * itemsize + weight_bytes,
    )

    kernel = functools.partial(_se_kernel, inv_hw=float(1.0 / HW),
                               channels_on_lanes=channels_on_lanes)
    x_block = (nb, HW, C) if channels_on_lanes else (nb, C, HW)

    def build(buffers):
        big_kwargs = {}
        if buffers > 2:
            big_kwargs = dict(pipeline_mode=pl.Buffered(buffers))
        grid_spec = pltpu.PrefetchScalarGridSpec(
            num_scalar_prefetch=0,
            grid=grid,
            in_specs=[
                pl.BlockSpec(x_block, lambda n: (n, 0, 0), **big_kwargs),
                pl.BlockSpec((C, Sq), lambda n: (0, 0)),
                pl.BlockSpec((1, Sq), lambda n: (0, 0)),
                pl.BlockSpec((Sq, C), lambda n: (0, 0)),
                pl.BlockSpec((1, C), lambda n: (0, 0)),
            ],
            out_specs=pl.BlockSpec(x_block, lambda n: (n, 0, 0), **big_kwargs),
        )
        return pl.pallas_call(
            kernel,
            out_shape=jax.ShapeDtypeStruct(x3.shape, x3.dtype),
            grid_spec=grid_spec,
            compiler_params=pltpu.CompilerParams(
                dimension_semantics=("parallel",),
                vmem_limit_bytes=vmem_limit,
            ),
            cost_estimate=cost,
        )

    try:
        out3 = build(3 if use_triple else 2)(x3, w1t, b1r, w2t, b2r)
    except Exception:
        if not use_triple:
            raise
        out3 = build(2)(x3, w1t, b1r, w2t, b2r)   # graceful fallback to 2 buffers

    return out3.reshape(x.shape)                   # free reshape back


if __name__ == "__main__":
    key = jax.random.PRNGKey(0)

    # ---- Test 1: NCHW / float32 (matches the PyTorch module layout) ----
    N, C, H, W = 2, 16, 16, 16
    Sq = _make_divisible(C // 4, 8)                            # -> 8
    kx, k1, k2, k3, k4, krest = jax.random.split(key, 6)
    x = jax.random.normal(kx, (N, C, H, W), dtype=jnp.float32)
    w1 = jax.random.normal(k1, (Sq, C), dtype=jnp.float32) * 0.1
    b1 = jax.random.normal(k2, (Sq,), dtype=jnp.float32) * 0.1
    w2 = jax.random.normal(k3, (C, Sq), dtype=jnp.float32) * 0.1
    b2 = jax.random.normal(k4, (C,), dtype=jnp.float32) * 0.1

    out = jax.block_until_ready(squeeze_excitation(x, w1, b1, w2, b2))
    ref = _reference(x, w1, b1, w2, b2, data_format="NCHW")
    assert out.shape == x.shape
    assert jnp.allclose(out, ref, atol=1e-5, rtol=1e-5), "NCHW mismatch vs reference"

    # ---- Test 2: NHWC / bf16, C on lanes (lane-dense small-HW stage),
    # partial last grid block (N=7, block_n=2) and 3-deep pipeline attempt ----
    N2, H2, W2, C2 = 7, 7, 7, 128
    Sq2 = _make_divisible(C2 // 4, 8)                          # -> 32
    k5, k6, k7, k8, k9 = jax.random.split(krest, 5)
    x2 = jax.random.normal(k5, (N2, H2, W2, C2), dtype=jnp.float32)
    x2 = x2.astype(jnp.bfloat16).astype(jnp.float32)           # pre-round input
    w1b = jax.random.normal(k6, (Sq2, C2), dtype=jnp.float32) * 0.1
    b1b = jax.random.normal(k7, (Sq2,), dtype=jnp.float32) * 0.1
    w2b = jax.random.normal(k8, (C2, Sq2), dtype=jnp.float32) * 0.1
    b2b = jax.random.normal(k9, (C2,), dtype=jnp.float32) * 0.1

    out2 = jax.block_until_ready(
        squeeze_excitation(x2.astype(jnp.bfloat16), w1b, b1b, w2b, b2b,
                           data_format="NHWC", block_n=2))
    ref2 = _reference(x2, w1b, b1b, w2b, b2b, data_format="NHWC")
    assert out2.shape == x2.shape
    assert jnp.allclose(out2.astype(jnp.float32), ref2, atol=5e-2, rtol=5e-2), \
        "NHWC/bf16 mismatch vs reference"

    print("KERNEL_OK")
</pallas_src>

<mosaic_0001>
module attributes {stable_mosaic.version = 11 : i64} {
  func.func @_se_kernel(%arg0: i32, %arg1: memref<2x16x256xf32, #tpu.memory_space<vmem>>, %arg2: memref<16x8xf32, #tpu.memory_space<vmem>>, %arg3: memref<1x8xf32, #tpu.memory_space<vmem>>, %arg4: memref<8x16xf32, #tpu.memory_space<vmem>>, %arg5: memref<1x16xf32, #tpu.memory_space<vmem>>, %arg6: memref<2x16x256xf32, #tpu.memory_space<vmem>>) attributes {dimension_semantics = [#tpu.dimension_semantics<parallel>], iteration_bounds = array<i64: 1>, scalar_prefetch = 0 : i64, scratch_operands = 0 : i64, tpu.core_type = #tpu.core_type<tc>, window_params = [{transform_indices = @transform_0, window_bounds = array<i64: 2, 16, 256>}, {pipeline_mode = #tpu.pipeline_mode<synchronous>, transform_indices = @transform_1, window_bounds = array<i64: 16, 8>}, {pipeline_mode = #tpu.pipeline_mode<synchronous>, transform_indices = @transform_2, window_bounds = array<i64: 1, 8>}, {pipeline_mode = #tpu.pipeline_mode<synchronous>, transform_indices = @transform_3, window_bounds = array<i64: 8, 16>}, {pipeline_mode = #tpu.pipeline_mode<synchronous>, transform_indices = @transform_4, window_bounds = array<i64: 1, 16>}, {transform_indices = @transform_5, window_bounds = array<i64: 2, 16, 256>}]} {
    %c0 = arith.constant 0 : index
    %c0_0 = arith.constant 0 : index
    %c0_1 = arith.constant 0 : index
    %0 = vector.load %arg1[%c0, %c0_0, %c0_1] : memref<2x16x256xf32, #tpu.memory_space<vmem>>, vector<2x16x256xf32>
    %cst = arith.constant dense<0.000000e+00> : vector<2x16xf32>
    %1 = vector.multi_reduction <add>, %0, %cst [2] : vector<2x16x256xf32> to vector<2x16xf32>
    %cst_2 = arith.constant 3.906250e-03 : f32
    %2 = vector.broadcast %cst_2 : f32 to vector<2x16xf32>
    %3 = arith.mulf %1, %2 : vector<2x16xf32>
    %c0_3 = arith.constant 0 : index
    %c0_4 = arith.constant 0 : index
    %4 = vector.load %arg2[%c0_3, %c0_4] : memref<16x8xf32, #tpu.memory_space<vmem>>, vector<16x8xf32>
    %cst_5 = arith.constant dense<0.000000e+00> : vector<2x8xf32>
    %5 = tpu.matmul %3, %4, %cst_5 {dimension_numbers = #tpu.dot_dimension_numbers<[1], [0], [0], [1], [0, 0, 1, 1], [], []>} : vector<2x16xf32>, vector<16x8xf32>, vector<2x8xf32> -> vector<2x8xf32>
    %c0_6 = arith.constant 0 : index
    %c0_7 = arith.constant 0 : index
    %6 = vector.load %arg3[%c0_6, %c0_7] : memref<1x8xf32, #tpu.memory_space<vmem>>, vector<1x8xf32>
    %7 = vector.broadcast %6 : vector<1x8xf32> to vector<2x8xf32>
    %8 = arith.addf %5, %7 : vector<2x8xf32>
    %cst_8 = arith.constant 0.000000e+00 : f32
    %9 = vector.broadcast %cst_8 : f32 to vector<2x8xf32>
    %10 = arith.maximumf %8, %9 : vector<2x8xf32>
    %c0_9 = arith.constant 0 : index
    %c0_10 = arith.constant 0 : index
    %11 = vector.load %arg4[%c0_9, %c0_10] : memref<8x16xf32, #tpu.memory_space<vmem>>, vector<8x16xf32>
    %cst_11 = arith.constant dense<0.000000e+00> : vector<2x16xf32>
    %12 = tpu.matmul %10, %11, %cst_11 {dimension_numbers = #tpu.dot_dimension_numbers<[1], [0], [0], [1], [0, 0, 1, 1], [], []>} : vector<2x8xf32>, vector<8x16xf32>, vector<2x16xf32> -> vector<2x16xf32>
    %c0_12 = arith.constant 0 : index
    %c0_13 = arith.constant 0 : index
    %13 = vector.load %arg5[%c0_12, %c0_13] : memref<1x16xf32, #tpu.memory_space<vmem>>, vector<1x16xf32>
    %14 = vector.broadcast %13 : vector<1x16xf32> to vector<2x16xf32>
    %15 = arith.addf %12, %14 : vector<2x16xf32>
    %cst_14 = arith.constant 0.000000e+00 : f32
    %cst_15 = arith.constant 1.000000e+00 : f32
    %16 = vector.broadcast %cst_14 : f32 to vector<2x16xf32>
    %17 = arith.maximumf %16, %15 : vector<2x16xf32>
    %18 = vector.broadcast %cst_15 : f32 to vector<2x16xf32>
    %19 = arith.minimumf %18, %17 : vector<2x16xf32>
    %20 = vector.shape_cast %19 : vector<2x16xf32> to vector<2x16x1xf32>
    %21 = vector.broadcast %20 : vector<2x16x1xf32> to vector<2x16x256xf32>
    %22 = arith.mulf %0, %21 : vector<2x16x256xf32>
    %c0_16 = arith.constant 0 : index
    %c0_17 = arith.constant 0 : index
    %c0_18 = arith.constant 0 : index
    %23 = vector.load %arg6[%c0_16, %c0_17, %c0_18] : memref<2x16x256xf32, #tpu.memory_space<vmem>>, vector<2x16x256xf32>
    tpu.vector_store %arg6[%c0_16, %c0_17, %c0_18], %22 {strides = array<i32>} : memref<2x16x256xf32, #tpu.memory_space<vmem>>, vector<2x16x256xf32>,
    return
  }
  func.func @transform_0(%arg0: i32) -> (i32, i32, i32) {
    %c0_i32 = arith.constant 0 : i32
    %c0_i32_0 = arith.constant 0 : i32
    %c0_i32_1 = arith.constant 0 : i32
    return %arg0, %c0_i32, %c0_i32_0 : i32, i32, i32
  }
  func.func @transform_1(%arg0: i32) -> (i32, i32) {
    %c0_i32 = arith.constant 0 : i32
    %c0_i32_0 = arith.constant 0 : i32
    %c0_i32_1 = arith.constant 0 : i32
    return %c0_i32, %c0_i32_0 : i32, i32
  }
  func.func @transform_2(%arg0: i32) -> (i32, i32) {
    %c0_i32 = arith.constant 0 : i32
    %c0_i32_0 = arith.constant 0 : i32
    %c0_i32_1 = arith.constant 0 : i32
    return %c0_i32, %c0_i32_0 : i32, i32
  }
  func.func @transform_3(%arg0: i32) -> (i32, i32) {
    %c0_i32 = arith.constant 0 : i32
    %c0_i32_0 = arith.constant 0 : i32
    %c0_i32_1 = arith.constant 0 : i32
    return %c0_i32, %c0_i32_0 : i32, i32
  }
  func.func @transform_4(%arg0: i32) -> (i32, i32) {
    %c0_i32 = arith.constant 0 : i32
    %c0_i32_0 = arith.constant 0 : i32
    %c0_i32_1 = arith.constant 0 : i32
    return %c0_i32, %c0_i32_0 : i32, i32
  }
  func.func @transform_5(%arg0: i32) -> (i32, i32, i32) {
    %c0_i32 = arith.constant 0 : i32
    %c0_i32_0 = arith.constant 0 : i32
    %c0_i32_1 = arith.constant 0 : i32
    return %arg0, %c0_i32, %c0_i32_0 : i32, i32, i32
  }
}

</mosaic_0001>

<bundles_post_ra>
// kernel: tpu_custom_call.1
= control target key start
LH: loop header
LB: loop body
LE: loop exit
PB: predicated region body
PF: predicated region fallthrough
CT: control target
= control target key end

     0   :  { %10 = vsyncpa [#allocation3], 0  ;;  %s502_s0 = inlined_call_operand.hbm [shape: f32[2,16,256], index: 0, kind: input, shape index: {}]   ;;  %s503_s1 = inlined_call_operand.vmem [shape: f32[16,8], index: 1, kind: input, shape index: {}]   ;;  %s504_s2 = inlined_call_operand.vmem [shape: f32[1,8], index: 2, kind: input, shape index: {}]   ;;  %s505_s3 = inlined_call_operand.vmem [shape: f32[8,16], index: 3, kind: input, shape index: {}]   ;;  %s506_s4 = inlined_call_operand.vmem [shape: f32[1,16], index: 4, kind: input, shape index: {}]   ;;  %s507_s5 = inlined_call_operand.hbm [shape: f32[2,16,256], index: 5, kind: output, shape index: {}]  }
   0x1   :  { %11 = vsyncpa [#allocation4], 0  ;;  %s388_s18 = smov [#allocation2]   ;;  %s340_s22 = scalar_lea.hbm %s502_s0, 1024 }
   0x2   :  { %s17_s19 = sshll.u32 %s388_s18, 4  ;;  %p341_p0 = scmp.ne.s32.totalorder %s502_s0, %s340_s22  ;;  %s18_s19 = int_to_ptr.vmem [resolvable:$true] %s17_s19 }
   0x3   :  { %p344_p1 = scmp.lt.u32.totalorder %s340_s22, %s502_s0 }
   0x5   :  { %p346_p2 = pnand %p344_p1, %p341_p0 }
   0x7   :  { %349 = shalt.err (!%p346_p2)
}
   0x8   :  { %s350_s27 = scalar_lea.vmem %s18_s19, 1024  ;;  %p355_p4 = scmp.lt.s32.totalorder %s18_s19, %s18_s19 }
   0x9   :  { %p351_p3 = scmp.ne.s32.totalorder %s18_s19, %s350_s27  ;;  %p356_p5 = scmp.lt.s32.totalorder %s350_s27, %s350_s27 }
   0xb   :  { %p357_p6 = por %p356_p5, %p355_p4 }
   0xd   :  { %p358_p7 = pnand %p357_p6, %p351_p3 }
   0xf   :  { %361 = shalt.err (!%p358_p7)
}
  0x10   :  { %s389_s28 = smov 256   ;;  %s390_s29 = smov 16  }
  0x11   :  { %23 = dma.hbm_to_vmem [thread:$0]  %s502_s0, 1024, %s18_s19, [#allocation3], %s389_s28, %s389_s28, %s390_s29  }
  0x12   :  { %384 = dma.done.wait [#allocation3], 1024  }
  0x13   :  { %385 = vsyncadd [#allocation3], 4294966272  ;;  %v440_v0 = vld [vmem:[#allocation2 + $0x20] sm:$0xff]  ;;  %v442_v1 = vld [vmem:[#allocation2 + $0x28] sm:$0xff]  ;;  %v391_v15 = vmov 0.0|0.0   ;;  %vm392_vm0 = vmmov 0   ;;  %v72_v17 = vlaneseq }
  0x14   :  { %v444_v2 = vld [vmem:[#allocation2] sm:$0xff]  ;;  %v49_v3 = vadd.f32 %v442_v1, %v440_v0  ;;  %v448_v4 = vld [vmem:[#allocation2 + $0x8] sm:$0xff]  ;;  %v450_v5 = vld [vmem:[#allocation2 + $0x30] sm:$0xff]  ;;  %330 = vmatprep.subr.bf16.mxu0 %v391_v15  ;;  %v393_v16 = vmov 0.0   ;;  %vm83_vm1 = vcmask 130112   ;;  %vm94_vm2 = vcmask 1041409  }
  0x15   :  { %v452_v6 = vld [vmem:[#allocation2 + $0x38] sm:$0xff]  ;;  %v43_v7 = vadd.f32 %v448_v4, %v444_v2  ;;  %v456_v8 = vld [vmem:[#allocation2 + $0x10] sm:$0xff]  ;;  %v59_v12 = vld [vmem:[%s503_s1] sm:$0xff]  ;;  %322 = vmatprep.mubr.msk.f32.mxu0 %vm392_vm0, %v393_v16  ;;  %325 = vmatprep.subr.mxu1 %v393_v16  ;;  %v73_v18 = vand.u32 127, %v72_v17  ;;  %v75_v19 = vshrl.u32 %v72_v17, 7  ;;  %vm96_vm3 = vcmask 130048  }
  0x16   :  { %v458_v9 = vld [vmem:[#allocation2 + $0x18] sm:$0xff]  ;;  %50 = vadd.xlane.f32.xlu1 %v49_v3  ;;  %v52_v10 = vadd.f32 %v452_v6, %v450_v5  ;;  %v60_v13 = vld [vmem:[%s503_s1 + $0x8] sm:$0xff]  ;;  %327 = vmatprep.mubr.msk.f32.mxu1 %vm392_vm0, %v393_v16  ;;  %v170_v38 = vld [vmem:[%s505_s3] sm:$0xff]  ;;  %vm178_vm4 = vcmask 64512  }
  0x17   :  { %44 = vadd.xlane.f32.xlu0 %v43_v7  ;;  %v46_v11 = vadd.f32 %v458_v9, %v456_v8  ;;  %v331_v14 = vpack.c.bf16 %v60_v13, %v59_v12  ;;  %v78_v20 = vadd.s32 4294967288, %v73_v18  ;;  %v76_v23 = vsub.s32 %v73_v18, %v75_v19  ;;  %326 = vmatpush3.msra.mxu1 %v170_v38  ;;  %v309_v39 = vld [vmem:[%s504_s2] ss:$0 sm:$0xff]  ;;  %s394_s2 = smov [#allocation5]  }
  0x18   :  { %v311_v44 = vld [vmem:[%s506_s4] ss:$0 sm:$0xff]  ;;  %v256_v49 = vsub.s32 0, %v75_v19  ;;  %v267_v52 = vsub.s32 1, %v75_v19  ;;  %s297_s3 = sshll.u32 %s394_s2, 4  ;;  %s298_s3 = int_to_ptr.vmem [resolvable:$true] %s297_s3 }
  0x19   :  { %332 = vmatpush3.bf16.msra.mxu0 %v331_v14  ;;  %v81_v25 = vsub.s32 %v78_v20, %v75_v19  ;;  %s362_s4 = scalar_lea.vmem %s298_s3, 1024  ;;  %p367_p9 = scmp.lt.s32.totalorder %s298_s3, %s298_s3 }
  0x1a   :  { %53 = vadd.xlane.f32.xlu1 %v52_v10  ;;  %p363_p8 = scmp.ne.s32.totalorder %s298_s3, %s362_s4  ;;  %p368_p10 = scmp.lt.s32.totalorder %s362_s4, %s362_s4 }
  0x1b   :  { %47 = vadd.xlane.f32.xlu0 %v46_v11 }
  0x1c   :  { %p369_p11 = por %p368_p10, %p367_p9 }
  0x1e   :  { %p370_p12 = pnand %p369_p11, %p363_p8 }
  0xa3   :  { %v51_v21 = vpop.xlane.xlu1 %50 }
  0xa4   :  { %v45_v22 = vpop.xlane.xlu0 %44  ;;  %v57_v24 = vmul.f32 0.00390625, %v51_v21 }
  0xa5   :  { %v55_v26 = vmul.f32 0.00390625, %v45_v22 }
  0xa6   :  { %v88_v31 = vrot.slane %v57_v24, %v76_v23 }
  0xa7   :  { %v54_v27 = vpop.xlane.xlu1 %53  ;;  %v77_v33 = vrot.slane %v55_v26, %v76_v23 }
  0xa8   :  { %v58_v28 = vmul.f32 0.00390625, %v54_v27  ;;  %v48_v29 = vpop.xlane.xlu0 %47 }
  0xa9   :  { %v56_v30 = vmul.f32 0.00390625, %v48_v29 }
  0xaa   :  { %v92_v32 = vrot.slane %v58_v28, %v81_v25 }
  0xab   :  { %v82_v34 = vrot.slane %v56_v30, %v81_v25 }
  0xac   :  { %v93_v35 = vsel %vm83_vm1, %v92_v32, %v88_v31 }
  0xad   :  { %v84_v36 = vsel %vm83_vm1, %v82_v34, %v77_v33 }
  0xae   :  { %v95_v37 = vsel %vm94_vm2, %v93_v35, %v84_v36 }
  0xaf   :  { %323 = vmatmul.mubr.msk.f32.vlgmr.msra.gmra.mrb[0].mxu0 %vm96_vm3, %v95_v37 }
 0x182   :  { %v165_v40 = vpop.f32.mrb[0].mxu0 }
 0x183   :  { %v166_v41 = vadd.f32 %v309_v39, %v165_v40  ;;  %v324_v42 = vpop.f32.mrb[1].mxu0 }
 0x185   :  { %v169_v43 = vmax.f32 %v166_v41, 0.0 }
 0x187   :  { %328 = vmatmul.mubr.msk.f32.vlgmr.msra.gmra.mrb[0].mxu1 %vm178_vm4, %v169_v43 }
 0x25a   :  { %v248_v45 = vpop.f32.mrb[0].mxu1 }
 0x25b   :  { %v249_v46 = vadd.f32 %v311_v44, %v248_v45  ;;  %v329_v47 = vpop.f32.mrb[1].mxu1 }
 0x25d   :  { %v252_v48 = vmax.f32 %v249_v46, 0.0 }
 0x25f   :  { %v253_v50 = vmin.f32 %v252_v48, 1.0 }
 0x261   :  { %v257_v51 = vrot.slane %v253_v50, %v256_v49  ;;  %v268_v53 = vrot.slane %v253_v50, %v267_v52 }
 0x263   :  { %263 = vbcast.lane.b32.xlu1 %v257_v51, 264  ;;  %259 = vbcast.lane.b32.xlu0 %v257_v51, 256 }
 0x267   :  { %270 = vbcast.lane.b32.xlu1 %v268_v53, 256 }
 0x26b   :  { %274 = vbcast.lane.b32.xlu1 %v268_v53, 264 }
 0x2d5   :  { %v264_v54 = vpop.permute.xlu1 %263  ;;  %v260_v55 = vpop.permute.xlu0 %259 }
 0x2d6   :  { %v278_v56 = vmul.f32 %v264_v54, %v456_v8  ;;  %v279_v57 = vmul.f32 %v264_v54, %v458_v9  ;;  %v276_v58 = vmul.f32 %v260_v55, %v444_v2  ;;  %v277_v59 = vmul.f32 %v260_v55, %v448_v4 }
 0x2d8   :  { %286 = vst [vmem:[#allocation5 + $0x10] sm:$0xff] %v278_v56  ;;  %287 = vst [vmem:[#allocation5 + $0x18] sm:$0xff] %v279_v57 }
 0x2d9   :  { %284 = vst [vmem:[#allocation5] sm:$0xff] %v276_v58  ;;  %285 = vst [vmem:[#allocation5 + $0x8] sm:$0xff] %v277_v59  ;;  %v271_v60 = vpop.permute.xlu1 %270 }
 0x2da   :  { %v280_v61 = vmul.f32 %v271_v60, %v440_v0  ;;  %v281_v62 = vmul.f32 %v271_v60, %v442_v1 }
 0x2dc   :  { %288 = vst [vmem:[#allocation5 + $0x20] sm:$0xff] %v280_v61  ;;  %289 = vst [vmem:[#allocation5 + $0x28] sm:$0xff] %v281_v62 }
 0x2dd   :  { %v275_v63 = vpop.permute.xlu1 %274 }
 0x2de   :  { %v282_v3 = vmul.f32 %v275_v63, %v450_v5  ;;  %v283_v2 = vmul.f32 %v275_v63, %v452_v6 }
 0x2e0   :  { %290 = vst [vmem:[#allocation5 + $0x30] sm:$0xff] %v282_v3  ;;  %291 = vst [vmem:[#allocation5 + $0x38] sm:$0xff] %v283_v2 }
 0x2e1   :  { %373 = shalt.err (!%p370_p12)
}
 0x2e2   :  { %s374_s17 = scalar_lea.hbm %s507_s5, 1024 }
 0x2e3   :  { %p375_p13 = scmp.ne.s32.totalorder %s507_s5, %s374_s17  ;;  %p378_p0 = scmp.lt.u32.totalorder %s374_s17, %s507_s5 }
 0x2e5   :  { %p380_p1 = pnand %p378_p0, %p375_p13 }
 0x2e7   :  { %383 = shalt.err (!%p380_p1)
}
 0x2e8   :  { %303 = dma.vmem_to_hbm [thread:$0]  %s298_s3, 1024, %s507_s5, [#allocation4], %s389_s28, %s389_s28, %s390_s29  }
 0x2e9   :  { %386 = dma.done.wait [#allocation4], 1024  }
 0x2ea   :  { %387 = vsyncadd [#allocation4], 4294966272 }
 0x2eb   :  { %307 = vsyncpa [#allocation3], 1 }
 0x2ec   :  { %308 = vsyncpa [#allocation4], 1 }

</bundles_post_ra>
